<compile_context>
chip_gen: v5e
topology: v5e:2x2
jax: 0.10.0
libtpu: 0.0.40
codegen_flags: <defaults>
</compile_context>

<pallas_src>
import functools

import jax
import jax.numpy as jnp
from jax import lax
from jax.experimental import pallas as pl
from jax.experimental.pallas import tpu as pltpu

_SMOOTH = 1.0
_BLOCK_BYTE_BUDGET = 4 << 20  # ~4 MiB per input block (per pipeline buffer)


def _dice_kernel(p_ref, t_ref, out_ref, acc_pt_ref, acc_den_ref, *,
                 total_rows, block_rows, total_batch, block_batch):
    i = pl.program_id(0)  # batch tile
    j = pl.program_id(1)  # row tile within the channel-0 slab

    @pl.when((i == 0) & (j == 0))
    def _init():
        acc_pt_ref[...] = jnp.zeros_like(acc_pt_ref)
        acc_den_ref[...] = jnp.zeros_like(acc_den_ref)

    p = p_ref[...].astype(jnp.float32)
    t = t_ref[...].astype(jnp.float32)

    # Mask ragged tails (only traced when the tile does not divide the axis;
    # out-of-bounds block contents are unspecified and must not be summed).
    if total_rows % block_rows != 0:
        row_ids = lax.broadcasted_iota(jnp.int32, p.shape, dimension=2)
        valid = row_ids < (total_rows - j * block_rows)
        p = jnp.where(valid, p, 0.0)
        t = jnp.where(valid, t, 0.0)
    if total_batch % block_batch != 0:
        batch_ids = lax.broadcasted_iota(jnp.int32, p.shape, dimension=0)
        valid = batch_ids < (total_batch - i * block_batch)
        p = jnp.where(valid, p, 0.0)
        t = jnp.where(valid, t, 0.0)

    # Per-step partial reductions (rows, then batch) onto one lane-wide f32
    # accumulator each; XLU work is free in this mem-bound, MXU-free kernel.
    pt = jnp.sum(p * t, axis=2, keepdims=True)   # (bn, 1, 1, L)
    pd = jnp.sum(p + t, axis=2, keepdims=True)
    pt = jnp.sum(pt, axis=0, keepdims=True)      # (1, 1, 1, L)
    pd = jnp.sum(pd, axis=0, keepdims=True)
    acc_pt_ref[...] += pt
    acc_den_ref[...] += pd

    @pl.when((i == pl.num_programs(0) - 1) & (j == pl.num_programs(1) - 1))
    def _finalize():
        inter = jnp.sum(acc_pt_ref[...])
        denom = jnp.sum(acc_den_ref[...])
        dsc = (2.0 * inter + _SMOOTH) / (denom + _SMOOTH)
        out_ref[0, 0] = 1.0 - dsc


@jax.jit
def dice_loss(y_pred, y_true):
    assert y_pred.shape == y_true.shape
    assert y_pred.ndim == 4, "expected NCHW inputs"
    N, C, H, W = y_pred.shape
    T = H * W
    itemsize = jnp.dtype(y_pred.dtype).itemsize

    # Lane-dense view of each item/channel slab when H*W is a multiple of 128
    # (free metadata reshape of the contiguous NCHW array); otherwise keep
    # rows=H, lanes=W (last two block dims then equal the full array dims).
    if T % 128 == 0:
        R, L = T // 128, 128
    else:
        R, L = H, W
    p4 = y_pred.reshape(N, C, R, L)
    t4 = y_true.reshape(N, C, R, L)

    # Row tile: the whole slab if it fits the per-buffer budget, else the
    # largest multiple of 8 rows that does (sized with the HBM dtype).
    padded_lanes = -(-L // 128) * 128
    bytes_per_8rows = 8 * padded_lanes * itemsize
    max_rows = 8 * max(1, _BLOCK_BYTE_BUDGET // bytes_per_8rows)
    r_block = R if R <= max_rows else max_rows
    num_row_tiles = -(-R // r_block)

    # Batch tile: grows only when a whole slab fits one block; no divisor
    # constraint on N (ragged tail is masked in-kernel).
    padded_rows = -(-r_block // 8) * 8
    slab_bytes = padded_rows * padded_lanes * itemsize
    if r_block == R:
        bn = min(N, max(1, _BLOCK_BYTE_BUDGET // slab_bytes))
    else:
        bn = 1
    num_batch_tiles = -(-N // bn)
    grid = (num_batch_tiles, num_row_tiles)

    # 2 inputs x 2 pipeline buffers x block, plus headroom for the tiny
    # accumulators; capped well under v7x's 64 MiB physical VMEM.
    block_vmem = bn * slab_bytes
    vmem_limit = int(min(48 << 20, max(16 << 20, 4 * block_vmem + (4 << 20))))

    # Channel 0 is selected purely via the BlockSpec: block size 1 on the
    # channel axis, block index pinned to 0 -> only channel-0 bytes are DMA'd.
    def chan0_map(i, j):
        return (i, 0, j, 0)

    in_spec = pl.BlockSpec((bn, 1, r_block, L), chan0_map)

    kernel = functools.partial(
        _dice_kernel,
        total_rows=R, block_rows=r_block,
        total_batch=N, block_batch=bn,
    )

    out = pl.pallas_call(
        kernel,
        out_shape=jax.ShapeDtypeStruct((1, 1), jnp.float32),
        grid_spec=pltpu.PrefetchScalarGridSpec(
            num_scalar_prefetch=0,
            grid=grid,
            in_specs=[in_spec, in_spec],
            out_specs=pl.BlockSpec(memory_space=pltpu.SMEM),
            scratch_shapes=[
                pltpu.VMEM((1, 1, 1, L), jnp.float32),  # sum(p * t) partials
                pltpu.VMEM((1, 1, 1, L), jnp.float32),  # sum(p) + sum(t) partials
            ],
        ),
        compiler_params=pltpu.CompilerParams(
            # Shared accumulators across all steps -> both axes sequential.
            dimension_semantics=("arbitrary", "arbitrary"),
            vmem_limit_bytes=vmem_limit,
        ),
    )(p4, t4)
    return out[0, 0]


if __name__ == "__main__":
    key = jax.random.PRNGKey(0)
    k1, k2 = jax.random.split(key)
    # small NCHW shapes consistent with a UNet-style segmentation output
    y_pred = jax.nn.sigmoid(jax.random.normal(k1, (2, 4, 16, 16), jnp.float32))
    y_true = (jax.random.uniform(k2, (2, 4, 16, 16)) > 0.5).astype(jnp.float32)

    loss = dice_loss(y_pred, y_true)
    loss = jax.block_until_ready(loss)

    # pure-JAX reference check
    p_ref = y_pred[:, 0].reshape(-1)
    t_ref = y_true[:, 0].reshape(-1)
    inter = jnp.sum(p_ref * t_ref)
    dsc = (2.0 * inter + 1.0) / (jnp.sum(p_ref) + jnp.sum(t_ref) + 1.0)
    ref = 1.0 - dsc
    assert jnp.allclose(loss, ref, atol=1e-5, rtol=1e-5), (loss, ref)

    print("KERNEL_OK")
</pallas_src>

<mosaic_0001>
module attributes {stable_mosaic.version = 11 : i64} {
  func.func @_dice_kernel(%arg0: i32, %arg1: i32, %arg2: memref<2x1x2x128xf32, #tpu.memory_space<vmem>>, %arg3: memref<2x1x2x128xf32, #tpu.memory_space<vmem>>, %arg4: memref<1x1xf32, #tpu.memory_space<smem>>, %arg5: memref<1x1x1x128xf32, #tpu.memory_space<vmem>>, %arg6: memref<1x1x1x128xf32, #tpu.memory_space<vmem>>) attributes {dimension_semantics = [#tpu.dimension_semantics<arbitrary>, #tpu.dimension_semantics<arbitrary>], iteration_bounds = array<i64: 1, 1>, scalar_prefetch = 0 : i64, scratch_operands = 2 : i64, tpu.core_type = #tpu.core_type<tc>, window_params = [{transform_indices = @transform_0, window_bounds = array<i64: 2, 1, 2, 128>}, {transform_indices = @transform_1, window_bounds = array<i64: 2, 1, 2, 128>}, {transform_indices = @transform_2, window_bounds = array<i64: 1, 1>}]} {
    %c0_i32 = arith.constant 0 : i32
    %0 = arith.cmpi eq, %arg0, %c0_i32 : i32
    %c0_i32_0 = arith.constant 0 : i32
    %1 = arith.cmpi eq, %arg1, %c0_i32_0 : i32
    %2 = arith.andi %0, %1 : i1
    %3 = arith.extui %2 : i1 to i32
    %c0_i32_1 = arith.constant 0 : i32
    %4 = arith.cmpi ne, %3, %c0_i32_1 : i32
    scf.if %4 {
      %cst_31 = arith.constant 0.000000e+00 : f32
      %28 = vector.broadcast %cst_31 : f32 to vector<1x1x1x128xf32>
      %c0_32 = arith.constant 0 : index
      %c0_33 = arith.constant 0 : index
      %c0_34 = arith.constant 0 : index
      %c0_35 = arith.constant 0 : index
      %29 = vector.load %arg5[%c0_32, %c0_33, %c0_34, %c0_35] : memref<1x1x1x128xf32, #tpu.memory_space<vmem>>, vector<1x1x1x128xf32>
      tpu.vector_store %arg5[%c0_32, %c0_33, %c0_34, %c0_35], %28 {strides = array<i32>} : memref<1x1x1x128xf32, #tpu.memory_space<vmem>>, vector<1x1x1x128xf32>,
      %cst_36 = arith.constant 0.000000e+00 : f32
      %30 = vector.broadcast %cst_36 : f32 to vector<1x1x1x128xf32>
      %c0_37 = arith.constant 0 : index
      %c0_38 = arith.constant 0 : index
      %c0_39 = arith.constant 0 : index
      %c0_40 = arith.constant 0 : index
      %31 = vector.load %arg6[%c0_37, %c0_38, %c0_39, %c0_40] : memref<1x1x1x128xf32, #tpu.memory_space<vmem>>, vector<1x1x1x128xf32>
      tpu.vector_store %arg6[%c0_37, %c0_38, %c0_39, %c0_40], %30 {strides = array<i32>} : memref<1x1x1x128xf32, #tpu.memory_space<vmem>>, vector<1x1x1x128xf32>,
    } else {
    }
    %c0 = arith.constant 0 : index
    %c0_2 = arith.constant 0 : index
    %c0_3 = arith.constant 0 : index
    %c0_4 = arith.constant 0 : index
    %5 = vector.load %arg2[%c0, %c0_2, %c0_3, %c0_4] : memref<2x1x2x128xf32, #tpu.memory_space<vmem>>, vector<2x1x2x128xf32>
    %c0_5 = arith.constant 0 : index
    %c0_6 = arith.constant 0 : index
    %c0_7 = arith.constant 0 : index
    %c0_8 = arith.constant 0 : index
    %6 = vector.load %arg3[%c0_5, %c0_6, %c0_7, %c0_8] : memref<2x1x2x128xf32, #tpu.memory_space<vmem>>, vector<2x1x2x128xf32>
    %7 = arith.mulf %5, %6 : vector<2x1x2x128xf32>
    %cst = arith.constant dense<0.000000e+00> : vector<2x1x128xf32>
    %8 = vector.multi_reduction <add>, %7, %cst [2] : vector<2x1x2x128xf32> to vector<2x1x128xf32>
    %9 = vector.shape_cast %8 : vector<2x1x128xf32> to vector<2x1x1x128xf32>
    %10 = arith.addf %5, %6 : vector<2x1x2x128xf32>
    %cst_9 = arith.constant dense<0.000000e+00> : vector<2x1x128xf32>
    %11 = vector.multi_reduction <add>, %10, %cst_9 [2] : vector<2x1x2x128xf32> to vector<2x1x128xf32>
    %12 = vector.shape_cast %11 : vector<2x1x128xf32> to vector<2x1x1x128xf32>
    %cst_10 = arith.constant dense<0.000000e+00> : vector<1x1x128xf32>
    %13 = vector.multi_reduction <add>, %9, %cst_10 [0] : vector<2x1x1x128xf32> to vector<1x1x128xf32>
    %14 = vector.shape_cast %13 : vector<1x1x128xf32> to vector<1x1x1x128xf32>
    %cst_11 = arith.constant dense<0.000000e+00> : vector<1x1x128xf32>
    %15 = vector.multi_reduction <add>, %12, %cst_11 [0] : vector<2x1x1x128xf32> to vector<1x1x128xf32>
    %16 = vector.shape_cast %15 : vector<1x1x128xf32> to vector<1x1x1x128xf32>
    %c0_12 = arith.constant 0 : index
    %c0_13 = arith.constant 0 : index
    %c0_14 = arith.constant 0 : index
    %c0_15 = arith.constant 0 : index
    %17 = vector.load %arg5[%c0_12, %c0_13, %c0_14, %c0_15] : memref<1x1x1x128xf32, #tpu.memory_space<vmem>>, vector<1x1x1x128xf32>
    %18 = arith.addf %17, %14 : vector<1x1x1x128xf32>
    %c0_16 = arith.constant 0 : index
    %c0_17 = arith.constant 0 : index
    %c0_18 = arith.constant 0 : index
    %c0_19 = arith.constant 0 : index
    %19 = vector.load %arg5[%c0_16, %c0_17, %c0_18, %c0_19] : memref<1x1x1x128xf32, #tpu.memory_space<vmem>>, vector<1x1x1x128xf32>
    tpu.vector_store %arg5[%c0_16, %c0_17, %c0_18, %c0_19], %18 {strides = array<i32>} : memref<1x1x1x128xf32, #tpu.memory_space<vmem>>, vector<1x1x1x128xf32>,
    %c0_20 = arith.constant 0 : index
    %c0_21 = arith.constant 0 : index
    %c0_22 = arith.constant 0 : index
    %c0_23 = arith.constant 0 : index
    %20 = vector.load %arg6[%c0_20, %c0_21, %c0_22, %c0_23] : memref<1x1x1x128xf32, #tpu.memory_space<vmem>>, vector<1x1x1x128xf32>
    %21 = arith.addf %20, %16 : vector<1x1x1x128xf32>
    %c0_24 = arith.constant 0 : index
    %c0_25 = arith.constant 0 : index
    %c0_26 = arith.constant 0 : index
    %c0_27 = arith.constant 0 : index
    %22 = vector.load %arg6[%c0_24, %c0_25, %c0_26, %c0_27] : memref<1x1x1x128xf32, #tpu.memory_space<vmem>>, vector<1x1x1x128xf32>
    tpu.vector_store %arg6[%c0_24, %c0_25, %c0_26, %c0_27], %21 {strides = array<i32>} : memref<1x1x1x128xf32, #tpu.memory_space<vmem>>, vector<1x1x1x128xf32>,
    %c0_i32_28 = arith.constant 0 : i32
    %23 = arith.cmpi eq, %arg0, %c0_i32_28 : i32
    %c0_i32_29 = arith.constant 0 : i32
    %24 = arith.cmpi eq, %arg1, %c0_i32_29 : i32
    %25 = arith.andi %23, %24 : i1
    %26 = arith.extui %25 : i1 to i32
    %c0_i32_30 = arith.constant 0 : i32
    %27 = arith.cmpi ne, %26, %c0_i32_30 : i32
    scf.if %27 {
      %c0_31 = arith.constant 0 : index
      %c0_32 = arith.constant 0 : index
      %c0_33 = arith.constant 0 : index
      %c0_34 = arith.constant 0 : index
      %28 = vector.load %arg5[%c0_31, %c0_32, %c0_33, %c0_34] : memref<1x1x1x128xf32, #tpu.memory_space<vmem>>, vector<1x1x1x128xf32>
      %29 = vector.shape_cast %28 : vector<1x1x1x128xf32> to vector<1x1x1x1x128xf32>
      %cst_35 = arith.constant dense<0.000000e+00> : vector<1xf32>
      %30 = vector.multi_reduction <add>, %29, %cst_35 [1, 2, 3, 4] : vector<1x1x1x1x128xf32> to vector<1xf32>
      %31 = vector.shape_cast %30 : vector<1xf32> to vector<1x1x1x1x1xf32>
      %32 = vector.extract %31[0, 0, 0, 0, 0] : f32 from vector<1x1x1x1x1xf32>
      %c0_36 = arith.constant 0 : index
      %c0_37 = arith.constant 0 : index
      %c0_38 = arith.constant 0 : index
      %c0_39 = arith.constant 0 : index
      %33 = vector.load %arg6[%c0_36, %c0_37, %c0_38, %c0_39] : memref<1x1x1x128xf32, #tpu.memory_space<vmem>>, vector<1x1x1x128xf32>
      %34 = vector.shape_cast %33 : vector<1x1x1x128xf32> to vector<1x1x1x1x128xf32>
      %cst_40 = arith.constant dense<0.000000e+00> : vector<1xf32>
      %35 = vector.multi_reduction <add>, %34, %cst_40 [1, 2, 3, 4] : vector<1x1x1x1x128xf32> to vector<1xf32>
      %36 = vector.shape_cast %35 : vector<1xf32> to vector<1x1x1x1x1xf32>
      %37 = vector.extract %36[0, 0, 0, 0, 0] : f32 from vector<1x1x1x1x1xf32>
      %cst_41 = arith.constant 2.000000e+00 : f32
      %38 = arith.mulf %cst_41, %32 : f32
      %cst_42 = arith.constant 1.000000e+00 : f32
      %39 = arith.addf %38, %cst_42 : f32
      %cst_43 = arith.constant 1.000000e+00 : f32
      %40 = arith.addf %37, %cst_43 : f32
      %41 = arith.divf %39, %40 : f32
      %cst_44 = arith.constant 1.000000e+00 : f32
      %42 = arith.subf %cst_44, %41 : f32
      %c0_45 = arith.constant 0 : index
      %c0_46 = arith.constant 0 : index
      %43 = memref.load %arg4[%c0_45, %c0_46] : memref<1x1xf32, #tpu.memory_space<smem>>
      memref.store %42, %arg4[%c0_45, %c0_46] : memref<1x1xf32, #tpu.memory_space<smem>>
    } else {
    }
    return
  }
  func.func @transform_0(%arg0: i32, %arg1: i32) -> (i32, i32, i32, i32) {
    %c0_i32 = arith.constant 0 : i32
    %c0_i32_0 = arith.constant 0 : i32
    %c0_i32_1 = arith.constant 0 : i32
    return %arg0, %c0_i32, %arg1, %c0_i32_0 : i32, i32, i32, i32
  }
  func.func @transform_1(%arg0: i32, %arg1: i32) -> (i32, i32, i32, i32) {
    %c0_i32 = arith.constant 0 : i32
    %c0_i32_0 = arith.constant 0 : i32
    %c0_i32_1 = arith.constant 0 : i32
    return %arg0, %c0_i32, %arg1, %c0_i32_0 : i32, i32, i32, i32
  }
  func.func @transform_2(%arg0: i32, %arg1: i32) -> (i32, i32) {
    %c0_i32 = arith.constant 0 : i32
    %c0_i32_0 = arith.constant 0 : i32
    %c0_i32_1 = arith.constant 0 : i32
    return %c0_i32, %c0_i32_0 : i32, i32
  }
}

</mosaic_0001>

<bundles_post_ra>
// kernel: dice_loss.1
= control target key start
LH: loop header
LB: loop body
LE: loop exit
PB: predicated region body
PF: predicated region fallthrough
CT: control target
= control target key end

     0   :  { %s270_s0 = inlined_call_operand.vmem [shape: f32[2,4,2,128], index: 0, kind: input, shape index: {}]   ;;  %s271_s1 = inlined_call_operand.vmem [shape: f32[2,4,2,128], index: 1, kind: input, shape index: {}]   ;;  %s272_s2 = inlined_call_operand.hbm [shape: f32[1,1], index: 2, kind: output, shape index: {}]  }
   0x1   :  { %v26_v0 = vld [vmem:[%s270_s0] sm:$0x3]  ;;  %v28_v1 = vld [vmem:[%s270_s0 + $0x8] sm:$0x3] }
   0x2   :  { %v65_v2 = vld [vmem:[%s271_s1] sm:$0x3]  ;;  %27 = vst [vmem:[#allocation4] sm:$0x3] %v26_v0  ;;  %v67_v3 = vld [vmem:[%s271_s1 + $0x8] sm:$0x3] }
   0x3   :  { %29 = vst [vmem:[#allocation4 + $0x2] sm:$0x3] %v28_v1 }
   0x4   :  { %7 = vsyncpa [#allocation7], 0  ;;  %66 = vst [vmem:[#allocation5] sm:$0x3] %v65_v2  ;;  %v238_v4 = vmov 0.0   ;;  %vm104_vm0 = vcmask 1041408  }
   0x5   :  { %68 = vst [vmem:[#allocation5 + $0x2] sm:$0x3] %v67_v3  ;;  %vm146_vm1 = vcmask 1040384   ;;  %s196_s22 = sshll.u32 %s272_s2, 4  ;;  %s239_s26 = smov [#allocation6]   ;;  %s197_s22 = int_to_ptr.hbm [resolvable:$true] %s196_s22 }
   0x6   :  { %96 = vst [vmem:[#allocation2] sm:$0x1] %v238_v4 }
   0x7   :  { %97 = vst [vmem:[#allocation3] sm:$0x1] %v238_v4 }
   0x9   :  { %v98_v5 = vld [vmem:[#allocation4] sm:$0x3] }
   0xa   :  { %v99_v6 = vld [vmem:[#allocation4 + $0x2] sm:$0x3] }
   0xb   :  { %v100_v7 = vld [vmem:[#allocation5] sm:$0x3] }
   0xc   :  { %v101_v8 = vld [vmem:[#allocation5 + $0x2] sm:$0x3]  ;;  %v102_v9 = vmul.f32 %v100_v7, %v98_v5  ;;  %v119_v10 = vadd.f32 %v100_v7, %v98_v5 }
   0xd   :  { %v103_v11 = vmul.f32 %v101_v8, %v99_v6  ;;  %v120_v12 = vadd.f32 %v101_v8, %v99_v6  ;;  %v137_v41 = vld [vmem:[#allocation2] sm:$0x1] }
   0xe   :  { %v105_v13 = vsel %vm104_vm0, %v102_v9, 0.0  ;;  %v121_v14 = vsel %vm104_vm0, %v119_v10, 0.0  ;;  %v140_v42 = vld [vmem:[#allocation3] sm:$0x1] }
   0xf   :  { %v106_v15 = vrot.slane %v105_v13, 4  ;;  %v112_v16 = vsel %vm104_vm0, %v103_v11, 0.0  ;;  %v122_v17 = vrot.slane %v121_v14, 4  ;;  %v128_v18 = vsel %vm104_vm0, %v120_v12, 0.0 }
  0x10   :  { %v113_v19 = vrot.slane %v112_v16, 4  ;;  %v129_v20 = vrot.slane %v128_v18, 4 }
  0x11   :  { %v107_v21 = vadd.f32 %v106_v15, %v105_v13  ;;  %v123_v22 = vadd.f32 %v122_v17, %v121_v14 }
  0x12   :  { %v114_v23 = vadd.f32 %v113_v19, %v112_v16  ;;  %v130_v24 = vadd.f32 %v129_v20, %v128_v18 }
  0x13   :  { %v108_v25 = vrot.slane %v107_v21, 2  ;;  %v124_v26 = vrot.slane %v123_v22, 2 }
  0x14   :  { %v115_v27 = vrot.slane %v114_v23, 2  ;;  %v131_v28 = vrot.slane %v130_v24, 2 }
  0x15   :  { %v109_v29 = vadd.f32 %v108_v25, %v107_v21  ;;  %v125_v30 = vadd.f32 %v124_v26, %v123_v22 }
  0x16   :  { %v116_v31 = vadd.f32 %v115_v27, %v114_v23  ;;  %v132_v32 = vadd.f32 %v131_v28, %v130_v24 }
  0x17   :  { %v110_v33 = vrot.slane %v109_v29, 1  ;;  %v126_v34 = vrot.slane %v125_v30, 1 }
  0x18   :  { %v117_v35 = vrot.slane %v116_v31, 1  ;;  %v133_v36 = vrot.slane %v132_v32, 1 }
  0x19   :  { %v111_v37 = vadd.f32 %v110_v33, %v109_v29  ;;  %v127_v38 = vadd.f32 %v126_v34, %v125_v30 }
  0x1a   :  { %v118_v39 = vadd.f32 %v117_v35, %v116_v31  ;;  %v134_v40 = vadd.f32 %v133_v36, %v132_v32 }
  0x1c   :  { %v135_v43 = vadd.f32 %v118_v39, %v111_v37  ;;  %v136_v44 = vadd.f32 %v134_v40, %v127_v38 }
  0x1e   :  { %v138_v45 = vadd.f32 %v137_v41, %v135_v43  ;;  %v141_v46 = vadd.f32 %v140_v42, %v136_v44 }
  0x20   :  { %139 = vst [vmem:[#allocation2] sm:$0x1] %v138_v45 }
  0x21   :  { %142 = vst [vmem:[#allocation3] sm:$0x1] %v141_v46 }
  0x27   :  { %v145_v47 = vld [vmem:[#allocation2] sm:$0x1] }
  0x28   :  { %v147_v48 = vsel %vm146_vm1, %v145_v47, 0.0  ;;  %v157_v49 = vld [vmem:[#allocation3] sm:$0x1] }
  0x29   :  { %148 = vadd.xlane.f32.xlu0 %v147_v48  ;;  %v158_v50 = vsel %vm146_vm1, %v157_v49, 0.0 }
  0x31   :  { %159 = vadd.xlane.f32.xlu0 %v158_v50 }
  0x9c   :  { %v149_v51 = vpop.xlane.xlu0 %148 }
  0x9d   :  { %v150_v52 = vrot.slane %v149_v51, 4 }
  0x9f   :  { %v151_v53 = vadd.f32 %v150_v52, %v149_v51 }
  0xa1   :  { %v152_v54 = vrot.slane %v151_v53, 2 }
  0xa3   :  { %v153_v55 = vadd.f32 %v152_v54, %v151_v53 }
  0xa4   :  { %v160_v56 = vpop.xlane.xlu0 %159 }
  0xa5   :  { %v161_v57 = vrot.slane %v160_v56, 4  ;;  %v154_v58 = vrot.slane %v153_v55, 1 }
  0xa7   :  { %v162_v59 = vadd.f32 %v161_v57, %v160_v56  ;;  %v155_v60 = vadd.f32 %v154_v58, %v153_v55 }
  0xa9   :  { %v163_v61 = vrot.slane %v162_v59, 2  ;;  %214 = vpush %v155_v60 }
  0xab   :  { %v164_v62 = vadd.f32 %v163_v61, %v162_v59 }
  0xad   :  { %v165_v63 = vrot.slane %v164_v62, 1 }
  0xaf   :  { %v166_v0 = vadd.f32 %v165_v63, %v164_v62 }
  0xb1   :  { %216 = vpush %v166_v0 }
  0xda   :  { %s215_s0 = spop %214 }
  0xdb   :  { %s168_s18 = smul.f32 2.0, %s215_s0 }
  0xdd   :  { %s169_s19 = sadd.f32 1.0, %s168_s18 }
  0xe2   :  { %s217_s1 = spop %216 }
  0xe3   :  { %s170_s17 = sadd.f32 1.0, %s217_s1 }
  0xe5   :  { %v171_v1 = vstv %s170_s17 }
  0xe6   :  { %222 = vrcp.f32 %v171_v1  ;;  %v183_v5 = vand.u32 2147483648, %v171_v1  ;;  %v181_v7 = vand.u32 2147483647, %v171_v1  ;;  %vm177_vm3 = vweird.f32 %v171_v1 }
  0xe8   :  { %v184_v9 = vor.u32 1.1754944e-38, %v183_v5  ;;  %vm182_vm5 = vcmp.eq.f32.partialorder %v181_v7, 8.507059e+37 }
  0xec   :  { %v223_v2 = vpop.eup %222 }
  0xed   :  { %v173_v3 = vmul.f32 %v223_v2, %v171_v1  ;;  %vm178_vm2 = vweird.f32 %v223_v2 }
  0xee   :  { %vm179_vm4 = vmor %vm177_vm3, %vm178_vm2 }
  0xef   :  { %v174_v4 = vsub.f32 1.0, %v173_v3 }
  0xf1   :  { %v175_v6 = vmul.f32 %v223_v2, %v174_v4 }
  0xf3   :  { %v176_v8 = vadd.f32 %v223_v2, %v175_v6 }
  0xf5   :  { %v180_v10 = vsel %vm179_vm4, %v223_v2, %v176_v8 }
  0xf6   :  { %v185_v11 = vsel %vm182_vm5, %v184_v9, %v180_v10 }
  0xf7   :  { %218 = vpush %v185_v11 }
 0x128   :  { %s219_s23 = spop %218 }
 0x129   :  { %s187_s24 = smul.f32 %s219_s23, %s169_s19 }
 0x12b   :  { %s188_s25 = ssub.f32 1.0, %s187_s24 }
 0x12d   :  { %190 = sst [smem:[#allocation6]] %s188_s25 }
 0x12e   :  { %199 = dma.smem_to_hbm %s239_s26, 16, %s197_s22, [#allocation7]  }
 0x12f   :  { %236 = dma.done.wait [#allocation7], 16  }
 0x130   :  { %237 = vsyncadd [#allocation7], 4294967280 }
 0x131   :  { %204 = sfence }
 0x132   :  { %205 = vsyncpa [#allocation7], 1 }

</bundles_post_ra>
